<compile_context>
chip_gen: v7x
topology: tpu7x:2x2x1
jax: 0.10.0
libtpu: 0.0.40
codegen_flags: <defaults>
</compile_context>

<pallas_src>
import functools

import jax
import jax.numpy as jnp
from jax.experimental import pallas as pl
from jax.experimental.pallas import tpu as pltpu

GAMMA_NEG = 4.0
GAMMA_POS = 1.0
CLIP = 0.05
EPS = 1e-8


def _int_pow(x, n):
    """x**n for a static non-negative integer n via repeated multiplication (VPU only)."""
    assert n >= 0
    if n == 0:
        return jnp.ones_like(x)
    result = None
    cur = x
    while n > 0:
        if n & 1:
            result = cur if result is None else result * cur
        n >>= 1
        if n:
            cur = cur * cur
    return result


def _asl_kernel(x_ref, y_ref, out_ref, *, gamma_neg, gamma_pos, clip, eps,
                binary_targets, integer_gammas, total_rows, block_rows,
                fold_lanes, approx_sigmoid):
    x = x_ref[...].astype(jnp.float32)
    y = y_ref[...].astype(jnp.float32)

    if approx_sigmoid:
        # EUP exp + EUP approx reciprocal; useful only when compute-bound (v7x).
        xs_pos = pl.reciprocal(1.0 + jnp.exp(-x), approx=True)
    else:
        xs_pos = jax.nn.sigmoid(x)                   # EUP
    xs_neg = 1.0 - xs_pos
    if clip is not None and clip > 0:
        xs_neg = jnp.minimum(xs_neg + clip, 1.0)

    use_focusing = (gamma_neg > 0) or (gamma_pos > 0)

    if binary_targets:
        # Contract: y in {0,1}. One log per element, integer-power focusing.
        is_pos = y > 0.0
        prob = jnp.where(is_pos, xs_pos, xs_neg)
        loss = jnp.log(jnp.maximum(prob, eps))       # single EUP log
        if use_focusing:
            base = 1.0 - prob                        # == 1 - xs_pos*y - xs_neg*(1-y)
            if integer_gammas:
                w = jnp.where(is_pos,
                              _int_pow(base, int(gamma_pos)),
                              _int_pow(base, int(gamma_neg)))    # pure VPU
            else:
                w = jnp.power(base, jnp.where(is_pos, gamma_pos, gamma_neg))
            loss = loss * w
    else:
        # General (soft-target) path: exact original formula.
        targets = y
        anti_targets = 1.0 - y
        loss = targets * jnp.log(jnp.maximum(xs_pos, eps))
        loss = loss + anti_targets * jnp.log(jnp.maximum(xs_neg, eps))
        if use_focusing:
            base = 1.0 - xs_pos * targets - xs_neg * anti_targets
            expo = gamma_pos * targets + gamma_neg * anti_targets
            loss = loss * jnp.power(base, expo)

    br, c = loss.shape

    # Mask padded tail rows (batch not divisible by block_rows) with a cheap
    # (br, 1) column mask broadcast along lanes. Must stay a select: padded
    # rows hold uninitialized VMEM and may have produced NaN/Inf above.
    if total_rows % block_rows != 0:
        i = pl.program_id(0)
        row = jax.lax.broadcasted_iota(jnp.int32, (br, 1), 0)
        valid = row < (total_rows - i * block_rows)
        loss = jnp.where(valid, loss, 0.0)

    # (block_rows, C) -> (8, C): sum groups of 8 sublanes (vreg-wise VPU adds).
    partial = jnp.sum(loss.reshape(br // 8, 8, c), axis=0)
    if fold_lanes:
        # (8, C) -> (8, 128): fold lane groups (each (8,128) slab is one vreg).
        partial = jnp.sum(partial.reshape(8, c // 128, 128), axis=1)
    out_ref[...] = partial[None]


def asymmetric_loss_optimized(x, y, *, gamma_neg=GAMMA_NEG, gamma_pos=GAMMA_POS,
                              clip=CLIP, eps=EPS, block_rows=None,
                              binary_targets=True, approx_sigmoid=False,
                              min_grid_steps=8):
    """x: (B, C) logits, y: (B, C) multi-label targets -> scalar loss (f32)."""
    B, C = x.shape
    assert y.shape == (B, C)
    # TODO(synk): for very large C (>~100k labels) add a second grid axis over C.

    # Sublane granularity from the narrowest input dtype (f32->8, bf16->16, i8->32).
    min_item = min(x.dtype.itemsize, y.dtype.itemsize)
    sub = {4: 8, 2: 16, 1: 32}.get(min_item, 8)

    # Generation-aware VMEM limit: ~half of physical per-core VMEM
    # (v5e/v6e: 128 MiB -> 64 MiB limit; v7x: 64 MiB -> 32 MiB limit).
    try:
        vmem_cap = int(pltpu.get_tpu_info().vmem_capacity_bytes)
    except Exception:
        vmem_cap = 64 * 1024 * 1024   # conservative (v7x per-TC) fallback
    vmem_limit = max(16 * 1024 * 1024, min(vmem_cap // 2, 64 * 1024 * 1024))

    padded_batch = -(-B // sub) * sub

    if block_rows is None:
        # Per row of a block: 2 pipeline buffers of each input + ~5 f32
        # kernel temporaries (x, y, xs_pos, prob/loss, base/w) -- conservative.
        input_bytes_per_row = 2 * (x.dtype.itemsize + y.dtype.itemsize) * C
        temp_bytes_per_row = 5 * 4 * C
        budget = int(vmem_limit * 0.75)
        block_rows = budget // (input_bytes_per_row + temp_bytes_per_row)
        block_rows = max(sub, min(2048, block_rows))
        # Guarantee >= min_grid_steps grid steps: pipelined DMA overlap and a
        # real megacore split on v7x ("parallel" axis) need multiple blocks.
        steps_cap = -(-B // (min_grid_steps * sub)) * sub
        block_rows = min(block_rows, steps_cap)
    # Never bigger than the (sublane-padded) batch, keep sublane-aligned.
    block_rows = min(block_rows, padded_batch)
    block_rows = max(sub, (block_rows // sub) * sub)

    num_blocks = pl.cdiv(B, block_rows)

    # Shrink the per-block partial along lanes when C is lane-aligned.
    fold_lanes = (C % 128 == 0)
    lanes_out = 128 if fold_lanes else C

    kernel = functools.partial(
        _asl_kernel,
        gamma_neg=gamma_neg, gamma_pos=gamma_pos, clip=clip, eps=eps,
        binary_targets=binary_targets,
        integer_gammas=(float(gamma_pos).is_integer()
                        and float(gamma_neg).is_integer()
                        and gamma_pos >= 0 and gamma_neg >= 0),
        total_rows=B, block_rows=block_rows,
        fold_lanes=fold_lanes, approx_sigmoid=approx_sigmoid)

    out_bytes = num_blocks * 8 * lanes_out * 4
    cost = pl.CostEstimate(
        flops=10 * B * C,
        transcendentals=3 * B * C,
        bytes_accessed=B * C * (x.dtype.itemsize + y.dtype.itemsize) + out_bytes,
    )

    partials = pl.pallas_call(
        kernel,
        out_shape=jax.ShapeDtypeStruct((num_blocks, 8, lanes_out), jnp.float32),
        grid_spec=pltpu.PrefetchScalarGridSpec(
            num_scalar_prefetch=0,
            grid=(num_blocks,),
            in_specs=[
                pl.BlockSpec((block_rows, C), lambda i: (i, 0)),
                pl.BlockSpec((block_rows, C), lambda i: (i, 0)),
            ],
            out_specs=pl.BlockSpec((1, 8, lanes_out), lambda i: (i, 0, 0)),
        ),
        compiler_params=pltpu.CompilerParams(
            # Independent per-block partials: the grid axis is parallel, so the
            # two TensorCores on v7x split the batch (no-op on v5e/v6e).
            dimension_semantics=("parallel",),
            vmem_limit_bytes=vmem_limit,
        ),
        cost_estimate=cost,
    )(x, y)

    # Tiny final reduction (num_blocks * 8 * lanes_out values) + negation in JAX.
    return -jnp.sum(partials)


def _reference(x, y, gamma_neg=GAMMA_NEG, gamma_pos=GAMMA_POS, clip=CLIP, eps=EPS):
    x = x.astype(jnp.float32)
    y = y.astype(jnp.float32)
    xs_pos = jax.nn.sigmoid(x)
    xs_neg = 1.0 - xs_pos
    if clip is not None and clip > 0:
        xs_neg = jnp.minimum(xs_neg + clip, 1.0)
    loss = y * jnp.log(jnp.maximum(xs_pos, eps))
    loss = loss + (1.0 - y) * jnp.log(jnp.maximum(xs_neg, eps))
    if gamma_neg > 0 or gamma_pos > 0:
        w = jnp.power(1.0 - xs_pos * y - xs_neg * (1.0 - y),
                      gamma_pos * y + gamma_neg * (1.0 - y))
        loss = loss * w
    return -loss.sum()


if __name__ == "__main__":
    key = jax.random.PRNGKey(0)
    kx, ky, kx2, ky2, kx3, ky3 = jax.random.split(key, 6)

    # Case 1: multi-label problem with lane-aligned C (fast binary path,
    # lane-folded (8,128) partials, several grid steps).
    B, C = 64, 256
    x = jax.random.normal(kx, (B, C), dtype=jnp.float32)
    y = (jax.random.uniform(ky, (B, C)) < 0.3).astype(jnp.float32)
    loss = jax.block_until_ready(asymmetric_loss_optimized(x, y, block_rows=16))
    ref = _reference(x, y)
    assert jnp.allclose(loss, ref, rtol=1e-4, atol=1e-3), (loss, ref)

    # Case 2: batch not divisible by block_rows -> exercises tail masking.
    B2, C2 = 20, 128
    x2 = jax.random.normal(kx2, (B2, C2), dtype=jnp.float32)
    y2 = (jax.random.uniform(ky2, (B2, C2)) < 0.3).astype(jnp.float32)
    loss2 = jax.block_until_ready(asymmetric_loss_optimized(x2, y2, block_rows=8))
    ref2 = _reference(x2, y2)
    assert jnp.allclose(loss2, ref2, rtol=1e-4, atol=1e-3), (loss2, ref2)

    # Case 3: general fallback path (no binary-target assumptions), auto tiling.
    loss3 = jax.block_until_ready(
        asymmetric_loss_optimized(x, y, binary_targets=False))
    assert jnp.allclose(loss3, ref, rtol=1e-4, atol=1e-3), (loss3, ref)

    # Case 4: narrow dtypes (bf16 logits, bf16 {0,1} targets) -> halved HBM traffic.
    xb = x.astype(jnp.bfloat16)
    yb = y.astype(jnp.bfloat16)
    loss4 = jax.block_until_ready(asymmetric_loss_optimized(xb, yb))
    ref4 = _reference(xb.astype(jnp.float32), yb.astype(jnp.float32))
    assert jnp.allclose(loss4, ref4, rtol=1e-3, atol=1e-2), (loss4, ref4)

    # Case 5: C not a multiple of 128 -> falls back to (8, C) partials.
    B5, C5 = 16, 96
    x5 = jax.random.normal(kx3, (B5, C5), dtype=jnp.float32)
    y5 = (jax.random.uniform(ky3, (B5, C5)) < 0.3).astype(jnp.float32)
    loss5 = jax.block_until_ready(asymmetric_loss_optimized(x5, y5))
    ref5 = _reference(x5, y5)
    assert jnp.allclose(loss5, ref5, rtol=1e-4, atol=1e-3), (loss5, ref5)

    print("KERNEL_OK")
</pallas_src>

<mosaic_0001>
module attributes {stable_mosaic.version = 11 : i64} {
  func.func @_asl_kernel(%arg0: i32, %arg1: memref<16x256xf32, #tpu.memory_space<vmem>>, %arg2: memref<16x256xf32, #tpu.memory_space<vmem>>, %arg3: memref<1x8x128xf32, #tpu.memory_space<vmem>>) attributes {dimension_semantics = [#tpu.dimension_semantics<parallel>], iteration_bounds = array<i64: 4>, scalar_prefetch = 0 : i64, scratch_operands = 0 : i64, tpu.core_type = #tpu.core_type<tc>, window_params = [{transform_indices = @transform_0, window_bounds = array<i64: 16, 256>}, {transform_indices = @transform_1, window_bounds = array<i64: 16, 256>}, {transform_indices = @transform_2, window_bounds = array<i64: 1, 8, 128>}]} {
    %c0 = arith.constant 0 : index
    %c0_0 = arith.constant 0 : index
    %0 = vector.load %arg1[%c0, %c0_0] : memref<16x256xf32, #tpu.memory_space<vmem>>, vector<16x256xf32>
    %c0_1 = arith.constant 0 : index
    %c0_2 = arith.constant 0 : index
    %1 = vector.load %arg2[%c0_1, %c0_2] : memref<16x256xf32, #tpu.memory_space<vmem>>, vector<16x256xf32>
    %2 = arith.negf %0 : vector<16x256xf32>
    %3 = math.exp %2 : vector<16x256xf32>
    %cst = arith.constant 1.000000e+00 : f32
    %4 = vector.broadcast %cst : f32 to vector<16x256xf32>
    %5 = arith.addf %4, %3 : vector<16x256xf32>
    %6 = arith.divf %4, %5 : vector<16x256xf32>
    %cst_3 = arith.constant 1.000000e+00 : f32
    %7 = vector.broadcast %cst_3 : f32 to vector<16x256xf32>
    %8 = arith.subf %7, %6 : vector<16x256xf32>
    %cst_4 = arith.constant 5.000000e-02 : f32
    %9 = vector.broadcast %cst_4 : f32 to vector<16x256xf32>
    %10 = arith.addf %8, %9 : vector<16x256xf32>
    %cst_5 = arith.constant 1.000000e+00 : f32
    %11 = vector.broadcast %cst_5 : f32 to vector<16x256xf32>
    %12 = arith.minimumf %10, %11 : vector<16x256xf32>
    %cst_6 = arith.constant 0.000000e+00 : f32
    %13 = vector.broadcast %cst_6 : f32 to vector<16x256xf32>
    %14 = arith.cmpf ogt, %1, %13 : vector<16x256xf32>
    %15 = arith.select %14, %6, %12 : vector<16x256xi1>, vector<16x256xf32>
    %cst_7 = arith.constant 9.99999993E-9 : f32
    %16 = vector.broadcast %cst_7 : f32 to vector<16x256xf32>
    %17 = arith.maximumf %15, %16 : vector<16x256xf32>
    %18 = math.log %17 : vector<16x256xf32>
    %cst_8 = arith.constant 1.000000e+00 : f32
    %19 = vector.broadcast %cst_8 : f32 to vector<16x256xf32>
    %20 = arith.subf %19, %15 : vector<16x256xf32>
    %21 = arith.mulf %20, %20 : vector<16x256xf32>
    %22 = arith.mulf %21, %21 : vector<16x256xf32>
    %23 = arith.select %14, %20, %22 : vector<16x256xi1>, vector<16x256xf32>
    %24 = arith.mulf %18, %23 : vector<16x256xf32>
    %25 = vector.shape_cast %24 : vector<16x256xf32> to vector<2x8x256xf32>
    %cst_9 = arith.constant dense<0.000000e+00> : vector<8x256xf32>
    %26 = vector.multi_reduction <add>, %25, %cst_9 [0] : vector<2x8x256xf32> to vector<8x256xf32>
    %27 = vector.shape_cast %26 : vector<8x256xf32> to vector<8x2x128xf32>
    %cst_10 = arith.constant dense<0.000000e+00> : vector<8x128xf32>
    %28 = vector.multi_reduction <add>, %27, %cst_10 [1] : vector<8x2x128xf32> to vector<8x128xf32>
    %29 = vector.shape_cast %28 : vector<8x128xf32> to vector<1x8x128xf32>
    %c0_11 = arith.constant 0 : index
    %c0_12 = arith.constant 0 : index
    %c0_13 = arith.constant 0 : index
    %30 = vector.load %arg3[%c0_11, %c0_12, %c0_13] : memref<1x8x128xf32, #tpu.memory_space<vmem>>, vector<1x8x128xf32>
    tpu.vector_store %arg3[%c0_11, %c0_12, %c0_13], %29 {strides = array<i32>} : memref<1x8x128xf32, #tpu.memory_space<vmem>>, vector<1x8x128xf32>,
    return
  }
  func.func @transform_0(%arg0: i32) -> (i32, i32) {
    %c0_i32 = arith.constant 0 : i32
    %c0_i32_0 = arith.constant 0 : i32
    return %arg0, %c0_i32 : i32, i32
  }
  func.func @transform_1(%arg0: i32) -> (i32, i32) {
    %c0_i32 = arith.constant 0 : i32
    %c0_i32_0 = arith.constant 0 : i32
    return %arg0, %c0_i32 : i32, i32
  }
  func.func @transform_2(%arg0: i32) -> (i32, i32, i32) {
    %c0_i32 = arith.constant 0 : i32
    %c0_i32_0 = arith.constant 0 : i32
    %c0_i32_1 = arith.constant 0 : i32
    return %arg0, %c0_i32, %c0_i32_0 : i32, i32, i32
  }
}

</mosaic_0001>

<bundles_post_ra>
// kernel: tpu_custom_call.1
= control target key start
LH: loop header
LB: loop body
LE: loop exit
PB: predicated region body
PF: predicated region fallthrough
CT: control target
= control target key end

     0   :  { %7 = vsyncpa [#allocation3], 0  ;;  %s1052_s0 = inlined_call_operand.hbm [shape: f32[64,256], index: 0, kind: input, shape index: {}]   ;;  %s1053_s1 = inlined_call_operand.hbm [shape: f32[64,256], index: 1, kind: input, shape index: {}]   ;;  %s1054_s2 = inlined_call_operand.hbm [shape: f32[4,8,128], index: 2, kind: output, shape index: {}]  }
   0x1   :  { %9 = vsyncpa [#allocation3 + $0x1], 0 }
   0x2   :  { %10 = vsyncpa [#allocation6], 0 }
   0x3   :  { %12 = vsyncpa [#allocation6 + $0x1], 0 }
   0x4   :  { %13 = vsyncpa [#allocation4], 0 }
   0x5   :  { %15 = vsyncpa [#allocation4 + $0x1], 0  ;;  %s808_s9 = smov 0   ;;  %s810_s10 = smov 0  }
   0x6   :  { %s812_s11 = smov 0   ;;  %s814_s12 = smov 0  }
   0x7 LB: > { %s829_s13 = sadd.s32 4294967295, %s783_s12   ;;  %s546_s14 = sadd.s32 4294967294, %s783_s12   ;;  %s783_s12 = sphi %s814_s12, %s1069_s12   ;;  %s779_s11 = sphi %s812_s11, %s1068_s11   ;;  %s775_s10 = sphi %s810_s10, %s1067_s10   ;;  %s771_s9 = sphi %s808_s9, %s1066_s9  }
   0x8   : > { %s833_s15 = sadd.s32 1, %s783_s12   ;;  %s28_s16 = sadd.s32 1, %s779_s11 }
   0x9   : > { %s25_s17 = ssub.s32 %s783_s12, %s833_s15  ;;  %p35_p0 = scmp.ne.s32.totalorder %s779_s11, %s775_s10 }
   0xa   : > { %p26_p1 = scmp.eq.s32.totalorder %s25_s17, 0  ;;  %p36_p2 = scmp.eq.s32.totalorder %s783_s12, 0 }
   0xb   : > { %p41_p3 = scmp.ne.s32.totalorder %s775_s10, %s771_s9  ;;  %p42_p4 = scmp.eq.s32.totalorder %s829_s13, 0 }
   0xc   : > { %s845_s18 = scalar_select %p26_p1, %s779_s11, %s28_s16  }
   0xd   : > { %p847_p5 = por %p36_p2, %p35_p0  ;;  %p851_p6 = por %p42_p4, %p41_p3 }
   0xe   : > { %p91_p7 = scmp.eq.s32.totalorder %s829_s13, 3  ;;  %p97_p8 = scmp.eq.s32.totalorder %s546_s14, 3 }
   0xf   : > { %s1058_s20 = scalar_select %p851_p6, 1, 0 }
  0x10   : > { %p590_p9 = scmp.lt.s32.totalorder %s783_s12, 4  ;;  %p857_p10 = por %p91_p7, %p35_p0 }
  0x11   : > { %p861_p11 = por %p97_p8, %p41_p3  ;;  %s866_s23 = sand.u32 1, %s779_s11  }
  0x12   : > { %s1059_s21 = scalar_select %p857_p10, 1, 0 }
  0x13   : > { %s1060_s22 = scalar_select %p861_p11, 1, 0 }
  0x14   : > { %s570_s24 = sshll.u32 %s783_s12, 9  ;;  %s549_s25 = sshll.u32 %s866_s23, 5 }
  0x15   : > { %s875_s28 = scalar_lea.hbm %s1052_s0, %s570_s24  ;;  %s121_s29 = scalar_lea.vmem [#allocation2], %s549_s25 }
  0x16   : > { %s129_s30 = sshll.u32 %s121_s29, 4  ;;  %p881_p12 = pnand %p590_p9, %p847_p5  ;;  %s885_s30 = int_to_ptr.vmem [resolvable:$true] %s129_s30 }
  0x17   : > { %s118_s4 = scalar_lea.sflag [#allocation3], %s866_s23  ;;  %s653_s5 = scalar_lea.hbm %s875_s28, 512 }
  0x18   : > { %p654_p13 = scmp.ne.s32.totalorder %s875_s28, %s653_s5  ;;  %p655_p0 = pneg %p881_p12 }
  0x19   : > { %s658_s8 = scalar_lea.hbm %s1052_s0, 2048  ;;  %p659_p3 = scmp.lt.u32.totalorder %s875_s28, %s1052_s0 }
  0x1a   : > { %p656_p1 = pnand %p655_p0, %p654_p13  ;;  %p660_p4 = scmp.lt.u32.totalorder %s658_s8, %s653_s5 }
  0x1b   : > { %p662_p7 = scmp.lt.u32.totalorder %s653_s5, %s875_s28 }
  0x1c   : > { %p657_p2 = pneg %p656_p1  ;;  %p661_p5 = por %p660_p4, %p659_p3 }
  0x1e   : > { %p663_p8 = por %p662_p7, %p661_p5 }
  0x20   : > { %p664_p9 = pnand %p663_p8, %p657_p2 }
  0x22   : > { %667 = shalt.err (!%p664_p9)
}
  0x23   : > { %s668_s17 = scalar_lea.vmem %s885_s30, 512  ;;  %s785_s19 = smov [#allocation2]  }
  0x24   : > { %p669_p13 = scmp.ne.s32.totalorder %s885_s30, %s668_s17  ;;  %s673_s26 = sshll.u32 %s785_s19, 4  ;;  %s674_s26 = int_to_ptr.vmem [resolvable:$false] %s673_s26 }
  0x25   : > { %s675_s27 = scalar_lea.vmem %s674_s26, 1024  ;;  %p676_p10 = scmp.lt.s32.totalorder %s885_s30, %s674_s26 }
  0x26   : > { %p671_p1 = pnand %p669_p13, %p655_p0  ;;  %p677_p3 = scmp.lt.s32.totalorder %s675_s27, %s668_s17 }
  0x28   : > { %p672_p11 = pneg %p671_p1  ;;  %p678_p4 = por %p677_p3, %p676_p10 }
  0x2a   : > { %p679_p5 = pnand %p678_p4, %p672_p11 }
  0x2c   : > { %682 = shalt.err (!%p679_p5)
}
  0x2d   : > { %s786_s29 = smov 256   ;;  %s787_s5 = smov 16  }
  0x2e   : > { %582 = dma.hbm_to_vmem [thread:$0]  (!%p881_p12), %s875_s28, 512, %s885_s30, %s118_s4, %s786_s29, %s786_s29, %s787_s5  }
  0x2f   : > { %p557_p10 = scmp.ge.s32.totalorder %s783_s12, 1  ;;  %p159_p11 = scmp.lt.s32.totalorder %s783_s12, 5 }
  0x30   : > { %s929_s14 = scalar_lea.hbm %s1053_s1, %s570_s24  ;;  %s143_s16 = scalar_lea.vmem [#allocation5], %s549_s25 }
  0x31   : > { %p920_p2 = pnand %p557_p10, %p159_p11  ;;  %s151_s17 = sshll.u32 %s143_s16, 4  ;;  %s933_s17 = int_to_ptr.vmem [resolvable:$true] %s151_s17 }
  0x32   : > { %s140_s28 = scalar_lea.sflag [#allocation6], %s866_s23  ;;  %s683_s30 = scalar_lea.hbm %s929_s14, 512 }
  0x33   : > { %p684_p7 = scmp.ne.s32.totalorder %s929_s14, %s683_s30  ;;  %s688_s24 = scalar_lea.hbm %s1053_s1, 2048 }
  0x34   : > { %p689_p13 = scmp.lt.u32.totalorder %s929_s14, %s1053_s1  ;;  %p690_p1 = scmp.lt.u32.totalorder %s688_s24, %s683_s30 }
  0x35   : > { %p686_p8 = pnand %p684_p7, %p655_p0  ;;  %p692_p4 = scmp.lt.u32.totalorder %s683_s30, %s929_s14 }
  0x36   : > { %p691_p3 = por %p690_p1, %p689_p13 }
  0x37   : > { %p687_p9 = pneg %p686_p8 }
  0x38   : > { %p693_p5 = por %p692_p4, %p691_p3 }
  0x3a   : > { %p694_p10 = pnand %p693_p5, %p687_p9 }
  0x3c   : > { %697 = shalt.err (!%p694_p10)
}
  0x3d   : > { %s698_s25 = scalar_lea.vmem %s933_s17, 512  ;;  %s788_s7 = smov [#allocation5]  }
  0x3e   : > { %p699_p11 = scmp.ne.s32.totalorder %s933_s17, %s698_s25  ;;  %s703_s8 = sshll.u32 %s788_s7, 4  ;;  %s704_s8 = int_to_ptr.vmem [resolvable:$false] %s703_s8 }
  0x3f   : > { %s705_s16 = scalar_lea.vmem %s704_s8, 1024  ;;  %p706_p6 = scmp.lt.s32.totalorder %s933_s17, %s704_s8 }
  0x40   : > { %p701_p7 = pnand %p699_p11, %p655_p0  ;;  %p707_p13 = scmp.lt.s32.totalorder %s705_s16, %s698_s25 }
  0x42   : > { %p702_p8 = pneg %p701_p7  ;;  %p708_p1 = por %p707_p13, %p706_p6 }
  0x44   : > { %p709_p3 = pnand %p708_p1, %p702_p8 }
  0x46   : > { %712 = shalt.err (!%p709_p3)
}
  0x47   : > { %585 = dma.hbm_to_vmem [thread:$0]  (!%p881_p12), %s929_s14, 512, %s933_s17, %s140_s28, %s786_s29, %s786_s29, %s787_s5  }
  0x48   : > { %163 = sbr.rel (%p920_p2) target bundleno = 180 (0xb4), region = 28  ;;  %s967_s30 = sand.u32 (!%p920_p2), 1, %s775_s10  }
  0x49   : > { %s558_s4 = sshll.u32 (!%p920_p2), %s967_s30, 5  ;;  %s166_s19 = scalar_lea.sflag (!%p920_p2), [#allocation3], %s967_s30 }
  0x4a   : > { %s169_s3 = scalar_lea.vmem (!%p920_p2), [#allocation2], %s558_s4  ;;  %p1063_p6 = scmp.ne.s32.totalorder (!%p920_p2), %s1058_s20, 0 }
  0x4f   : > { %758 = dma.done.wait (%p1063_p6), %s166_s19, 512  }
  0x50   : > { %760 = vsyncadd (%p1063_p6), %s166_s19, 4294966784  ;;  %s175_s23 = scalar_lea.sflag [#allocation6], %s967_s30  ;;  %s976_s29 = scalar_lea.vmem [#allocation5], %s558_s4 }
  0x51   : > { %762 = dma.done.wait (%p1063_p6), %s175_s23, 512  }
  0x52   : > { %764 = vsyncadd (%p1063_p6), %s175_s23, 4294966784  ;;  %v206_v0 = vld [vmem:[%s169_s3] sm:$0xff]  ;;  %v207_v1 = vld [vmem:[%s169_s3 + $0x8] sm:$0xff]  ;;  %v789_v54 = vmov 1983009808   ;;  %v296_v56 = vlaneseq  ;;  %vm358_vm4 = vcmask 1041408  }
  0x53   : > { %v208_v2 = vld [vmem:[%s169_s3 + $0x10] sm:$0xff]  ;;  %v209_v3 = vld [vmem:[%s169_s3 + $0x18] sm:$0xff]  ;;  %v561_v4 = vmul.f32 -1.442695, %v206_v0  ;;  %v562_v5 = vmul.f32 -1.442695, %v207_v1  ;;  %v294_v55 = vunpack.c.l.s4 %v789_v54 }
  0x54   : > { %v563_v6 = vmul.f32 -1.442695, %v208_v2  ;;  %v564_v7 = vmul.f32 -1.442695, %v209_v3  ;;  %v210_v18 = vld [vmem:[%s976_s29] sm:$0xff]  ;;  %v211_v21 = vld [vmem:[%s976_s29 + $0x8] sm:$0xff] }
  0x55   : > { %629 = vpow2.f32 %v561_v4  ;;  %v212_v24 = vld [vmem:[%s976_s29 + $0x10] sm:$0xff]  ;;  %v213_v27 = vld [vmem:[%s976_s29 + $0x18] sm:$0xff]  ;;  %vm250_vm0 = vcmp.gt.f32.partialorder %v210_v18, 0.0  ;;  %vm251_vm1 = vcmp.gt.f32.partialorder %v211_v21, 0.0  ;;  %v295_v0 = vunpack.c.0.s8 %v294_v55  ;;  %s560_s20 = sshll.u32 %s967_s30, 3  ;;  %s566_s14 = sshll.u32 %s829_s13, 7 }
  0x56   : > { %631 = vpow2.f32 %v562_v5  ;;  %vm252_vm2 = vcmp.gt.f32.partialorder %v212_v24, 0.0  ;;  %vm253_vm3 = vcmp.gt.f32.partialorder %v213_v27, 0.0  ;;  %v297_v1 = vshrl.u32 %v296_v56, 7  ;;  %s203_s5 = scalar_lea.vmem [#allocation7], %s560_s20  ;;  %s1011_s24 = scalar_lea.hbm %s1054_s2, %s566_s14 }
  0x57   : > { %633 = vpow2.f32 %v563_v6  ;;  %v790_v5 = vmov 1934713408   ;;  %vm423_vm5 = vcmask 1041409   ;;  %vm425_vm6 = vcmask 1042434   ;;  %s453_s6 = sshll.u32 %s203_s5, 4  ;;  %s440_s26 = scalar_lea.sflag [#allocation4], %s967_s30  ;;  %s1006_s6 = int_to_ptr.vmem [resolvable:$true] %s453_s6 }
  0x58   : > { %635 = vpow2.f32 %v564_v7  ;;  %v325_v6 = vunpack.c.l.s4 %v790_v5  ;;  %vm427_vm7 = vcmask 1043459   ;;  %vm429_vm8 = vcmask 1044484   ;;  %s713_s27 = scalar_lea.vmem %s1006_s6, 128  ;;  %p1064_p0 = scmp.ne.s32.totalorder %s1059_s21, 0 }
  0x59   : > { %vm431_vm9 = vcmask 1045509   ;;  %vm433_vm10 = vcmask 1046534   ;;  %vm435_vm11 = vcmask 1047559   ;;  %p714_p12 = scmp.ne.s32.totalorder %s1006_s6, %s713_s27  ;;  %s792_s13 = smov [#allocation7]  }
  0x5a   : > { %s717_s25 = sshll.u32 %s792_s13, 4  ;;  %s718_s25 = int_to_ptr.vmem [resolvable:$false] %s717_s25 }
  0x5b   : > { %p715_p2 = pnand %p714_p12, %p1064_p0  ;;  %s719_s7 = scalar_lea.vmem %s718_s25, 256 }
  0x5c   : > { %p720_p4 = scmp.lt.s32.totalorder %s1006_s6, %s718_s25  ;;  %p721_p5 = scmp.lt.s32.totalorder %s719_s7, %s713_s27 }
  0x5d   : > { %p716_p9 = pneg %p715_p2 }
  0x5e   : > { %p722_p10 = por %p721_p5, %p720_p4 }
  0x5f   : > { %v630_v8 = vpop.eup %629 }
  0x60   : > { %v632_v9 = vpop.eup %631  ;;  %v226_v10 = vadd.f32 1.0, %v630_v8  ;;  %p723_p11 = pnand %p722_p10, %p716_p9 }
  0x61   : > { %v634_v11 = vpop.eup %633  ;;  %v227_v12 = vadd.f32 1.0, %v632_v9 }
  0x62   : > { %v636_v13 = vpop.eup %635  ;;  %v228_v14 = vadd.f32 1.0, %v634_v11  ;;  %637 = vrcp.f32 %v226_v10 }
  0x63   : > { %v229_v15 = vadd.f32 1.0, %v636_v13  ;;  %639 = vrcp.f32 %v227_v12 }
  0x64   : > { %641 = vrcp.f32 %v228_v14  ;;  %v298_v14 = vsub.s32 %v295_v0, %v297_v1 }
  0x65   : > { %643 = vrcp.f32 %v229_v15 }
  0x6c   : > { %v638_v16 = vpop.eup %637 }
  0x6d   : > { %v640_v17 = vpop.eup %639  ;;  %v238_v19 = vsub.f32 1.0, %v638_v16 }
  0x6e   : > { %v642_v20 = vpop.eup %641  ;;  %v239_v22 = vsub.f32 1.0, %v640_v17 }
  0x6f   : > { %v644_v23 = vpop.eup %643  ;;  %v240_v25 = vsub.f32 1.0, %v642_v20  ;;  %v242_v26 = vadd.f32 0.05, %v238_v19  ;;  %v791_v19 = vmov 0.0  }
  0x70   : > { %v241_v28 = vsub.f32 1.0, %v644_v23  ;;  %v243_v29 = vadd.f32 0.05, %v239_v22 }
  0x71   : > { %v244_v30 = vadd.f32 0.05, %v240_v25  ;;  %v246_v31 = vmin.f32 %v242_v26, 1.0 }
  0x72   : > { %v245_v32 = vadd.f32 0.05, %v241_v28  ;;  %v247_v33 = vmin.f32 %v243_v29, 1.0 }
  0x73   : > { %v248_v34 = vmin.f32 %v244_v30, 1.0  ;;  %v254_v35 = vsel %vm250_vm0, %v638_v16, %v246_v31  ;;  %v326_v16 = vunpack.c.0.s8 %v325_v6 }
  0x74   : > { %v249_v36 = vmin.f32 %v245_v32, 1.0  ;;  %v255_v37 = vsel %vm251_vm1, %v640_v17, %v247_v33  ;;  %v258_v38 = vmax.f32 %v254_v35, 1e-08  ;;  %v270_v39 = vsub.f32 1.0, %v254_v35 }
  0x75   : > { %v256_v40 = vsel %vm252_vm2, %v642_v20, %v248_v34  ;;  %v259_v41 = vmax.f32 %v255_v37, 1e-08  ;;  %v271_v42 = vsub.f32 1.0, %v255_v37  ;;  %v329_v24 = vsub.s32 %v326_v16, %v297_v1 }
  0x76   : > { %v257_v43 = vsel %vm253_vm3, %v644_v23, %v249_v36  ;;  %v260_v44 = vmax.f32 %v256_v40, 1e-08  ;;  %645 = vlog2.f32 %v258_v38  ;;  %v272_v45 = vsub.f32 1.0, %v256_v40 }
  0x77   : > { %v261_v46 = vmax.f32 %v257_v43, 1e-08  ;;  %647 = vlog2.f32 %v259_v41  ;;  %v273_v47 = vsub.f32 1.0, %v257_v43  ;;  %v274_v48 = vmul.f32 %v270_v39, %v270_v39 }
  0x78   : > { %649 = vlog2.f32 %v260_v44  ;;  %v275_v49 = vmul.f32 %v271_v42, %v271_v42  ;;  %v276_v50 = vmul.f32 %v272_v45, %v272_v45 }
  0x79   : > { %651 = vlog2.f32 %v261_v46  ;;  %v277_v51 = vmul.f32 %v273_v47, %v273_v47  ;;  %v278_v52 = vmul.f32 %v274_v48, %v274_v48 }
  0x7a   : > { %v279_v53 = vmul.f32 %v275_v49, %v275_v49  ;;  %v280_v57 = vmul.f32 %v276_v50, %v276_v50 }
  0x7b   : > { %v281_v58 = vmul.f32 %v277_v51, %v277_v51  ;;  %v282_v60 = vsel %vm250_vm0, %v270_v39, %v278_v52 }
  0x7c   : > { %v283_v63 = vsel %vm251_vm1, %v271_v42, %v279_v53  ;;  %v284_v4 = vsel %vm252_vm2, %v272_v45, %v280_v57 }
  0x7d   : > { %v285_v9 = vsel %vm253_vm3, %v273_v47, %v281_v58 }
  0x80   : > { %v646_v59 = vpop.eup %645 }
  0x81   : > { %v648_v61 = vpop.eup %647  ;;  %v263_v62 = vmul.f32 0.6931472, %v646_v59 }
  0x82   : > { %v650_v2 = vpop.eup %649  ;;  %v265_v3 = vmul.f32 0.6931472, %v648_v61 }
  0x83   : > { %v652_v7 = vpop.eup %651  ;;  %v267_v8 = vmul.f32 0.6931472, %v650_v2  ;;  %v286_v10 = vmul.f32 %v282_v60, %v263_v62 }
  0x84   : > { %v269_v11 = vmul.f32 0.6931472, %v652_v7  ;;  %v287_v12 = vmul.f32 %v283_v63, %v265_v3 }
  0x85   : > { %v288_v13 = vmul.f32 %v284_v4, %v267_v8 }
  0x86   : > { %v289_v15 = vmul.f32 %v285_v9, %v269_v11 }
  0x87   : > { %v290_v17 = vadd.f32 %v288_v13, %v286_v10 }
  0x88   : > { %v291_v18 = vadd.f32 %v289_v15, %v287_v12 }
  0x89   : > { %v292_v20 = vcombine.high %v290_v17, %v791_v19  ;;  %v299_v21 = vrot.slane %v290_v17, %v298_v14 }
  0x8a   : > { %v307_v22 = vcombine.high %v291_v18, %v791_v19  ;;  %v314_v23 = vrot.slane %v291_v18, %v298_v14 }
  0x8b   : > { %v306_v25 = vrot.slane %v292_v20, %v298_v14 }
  0x8c   : > { %v321_v26 = vrot.slane %v307_v22, %v298_v14  ;;  %v322_v28 = vcombine.low %v299_v21, %v314_v23  ;;  %v323_v27 = vcombine.high %v299_v21, %v314_v23 }
  0x8e   : > { %v330_v29 = vrot.slane %v322_v28, %v329_v24  ;;  %v337_v30 = vrot.slane %v323_v27, %v329_v24  ;;  %v338_v31 = vcombine.low %v306_v25, %v321_v26  ;;  %v339_v32 = vcombine.high %v306_v25, %v321_v26 }
  0x90   : > { %v346_v33 = vrot.slane %v338_v31, %v329_v24  ;;  %v353_v34 = vrot.slane %v339_v32, %v329_v24  ;;  %v354_v35 = vcombine.high %v330_v29, %v791_v19  ;;  %v355_v36 = vcombine.high %v337_v30, %v791_v19 }
  0x91   : > { %v359_v37 = vsel %vm358_vm4, %v330_v29, 0.0  ;;  %v373_v38 = vsel %vm358_vm4, %v337_v30, 0.0 }
  0x92   : > { %v356_v39 = vcombine.high %v346_v33, %v791_v19  ;;  %v357_v40 = vcombine.high %v353_v34, %v791_v19  ;;  %v360_v41 = vrot.slane %v359_v37, 4  ;;  %v366_v42 = vsel %vm358_vm4, %v354_v35, 0.0 }
  0x93   : > { %v367_v43 = vrot.slane %v366_v42, 4  ;;  %v374_v44 = vrot.slane %v373_v38, 4  ;;  %v380_v45 = vsel %vm358_vm4, %v355_v36, 0.0  ;;  %v387_v46 = vsel %vm358_vm4, %v346_v33, 0.0 }
  0x94   : > { %v361_v47 = vadd.f32 %v360_v41, %v359_v37  ;;  %v381_v48 = vrot.slane %v380_v45, 4  ;;  %v388_v49 = vrot.slane %v387_v46, 4  ;;  %v394_v50 = vsel %vm358_vm4, %v356_v39, 0.0 }
  0x95   : > { %v368_v51 = vadd.f32 %v367_v43, %v366_v42  ;;  %v375_v52 = vadd.f32 %v374_v44, %v373_v38  ;;  %v395_v53 = vrot.slane %v394_v50, 4  ;;  %v401_v54 = vsel %vm358_vm4, %v353_v34, 0.0 }
  0x96   : > { %v362_v55 = vrot.slane %v361_v47, 2  ;;  %v382_v56 = vadd.f32 %v381_v48, %v380_v45  ;;  %v389_v57 = vadd.f32 %v388_v49, %v387_v46  ;;  %v402_v58 = vrot.slane %v401_v54, 4 }
  0x97   : > { %v369_v59 = vrot.slane %v368_v51, 2  ;;  %v376_v60 = vrot.slane %v375_v52, 2  ;;  %v396_v61 = vadd.f32 %v395_v53, %v394_v50  ;;  %v408_v62 = vsel %vm358_vm4, %v357_v40, 0.0 }
  0x98   : > { %v363_v63 = vadd.f32 %v362_v55, %v361_v47  ;;  %v383_v0 = vrot.slane %v382_v56, 2  ;;  %v390_v1 = vrot.slane %v389_v57, 2  ;;  %v403_v2 = vadd.f32 %v402_v58, %v401_v54 }
  0x99   : > { %v370_v3 = vadd.f32 %v369_v59, %v368_v51  ;;  %v377_v4 = vadd.f32 %v376_v60, %v375_v52  ;;  %v397_v5 = vrot.slane %v396_v61, 2  ;;  %v409_v6 = vrot.slane %v408_v62, 4 }
  0x9a   : > { %v364_v7 = vrot.slane %v363_v63, 1  ;;  %v384_v8 = vadd.f32 %v383_v0, %v382_v56  ;;  %v391_v9 = vadd.f32 %v390_v1, %v389_v57  ;;  %v404_v10 = vrot.slane %v403_v2, 2 }
  0x9b   : > { %v371_v11 = vrot.slane %v370_v3, 1  ;;  %v378_v12 = vrot.slane %v377_v4, 1  ;;  %v398_v13 = vadd.f32 %v397_v5, %v396_v61  ;;  %v410_v14 = vadd.f32 %v409_v6, %v408_v62 }
  0x9c   : > { %v365_v15 = vadd.f32 %v364_v7, %v363_v63  ;;  %v385_v16 = vrot.slane %v384_v8, 1  ;;  %v392_v17 = vrot.slane %v391_v9, 1  ;;  %v405_v18 = vadd.f32 %v404_v10, %v403_v2 }
  0x9d   : > { %v372_v19 = vadd.f32 %v371_v11, %v370_v3  ;;  %v379_v20 = vadd.f32 %v378_v12, %v377_v4  ;;  %v399_v21 = vrot.slane %v398_v13, 1  ;;  %v411_v22 = vrot.slane %v410_v14, 2 }
  0x9e   : > { %v386_v23 = vadd.f32 %v385_v16, %v384_v8  ;;  %v393_v24 = vadd.f32 %v392_v17, %v391_v9  ;;  %v406_v25 = vrot.slane %v405_v18, 1 }
  0x9f   : > { %v400_v26 = vadd.f32 %v399_v21, %v398_v13  ;;  %v412_v28 = vadd.f32 %v411_v22, %v410_v14  ;;  %v424_v27 = vsel %vm423_vm5, %v372_v19, %v365_v15 }
  0xa0   : > { %v407_v29 = vadd.f32 %v406_v25, %v405_v18  ;;  %v426_v30 = vsel %vm425_vm6, %v379_v20, %v424_v27 }
  0xa1   : > { %v413_v31 = vrot.slane %v412_v28, 1  ;;  %v428_v32 = vsel %vm427_vm7, %v386_v23, %v426_v30 }
  0xa2   : > { %v430_v33 = vsel %vm429_vm8, %v393_v24, %v428_v32 }
  0xa3   : > { %v414_v34 = vadd.f32 %v413_v31, %v412_v28  ;;  %v432_v35 = vsel %vm431_vm9, %v400_v26, %v430_v33 }
  0xa4   : > { %v434_v36 = vsel %vm433_vm10, %v407_v29, %v432_v35 }
  0xa5   : > { %v436_v37 = vsel %vm435_vm11, %v414_v34, %v434_v36 }
  0xa6   : > { %438 = vst [vmem:[%s203_s5] sm:$0xff] %v436_v37 }
  0xa7   : > { %726 = shalt.err (!%p723_p11)
}
  0xa8   : > { %s727_s8 = scalar_lea.hbm %s1011_s24, 128  ;;  %s731_s4 = scalar_lea.hbm %s1054_s2, 512 }
  0xa9   : > { %p728_p7 = scmp.ne.s32.totalorder %s1011_s24, %s727_s8  ;;  %p732_p1 = scmp.lt.u32.totalorder %s1011_s24, %s1054_s2 }
  0xaa   : > { %p733_p3 = scmp.lt.u32.totalorder %s731_s4, %s727_s8  ;;  %p735_p12 = scmp.lt.u32.totalorder %s727_s8, %s1011_s24 }
  0xab   : > { %p729_p8 = pnand %p728_p7, %p1064_p0 }
  0xac   : > { %p734_p6 = por %p733_p3, %p732_p1 }
  0xad   : > { %p730_p13 = pneg %p729_p8 }
  0xae   : > { %p736_p2 = por %p735_p12, %p734_p6 }
  0xb0   : > { %p737_p9 = pnand %p736_p2, %p730_p13 }
  0xb2   : > { %740 = shalt.err (!%p737_p9)
}
  0xb3   : > { %577 = dma.vmem_to_hbm [thread:$0]  (%p1064_p0), %s1006_s6, 128, %s1011_s24, %s440_s26  }
  0xb4 PF: > { %p591_p4 = scmp.ge.s32.totalorder %s783_s12, 2  ;;  %s465_s23 = sand.u32 1, %s771_s9  }
  0xb5   : > { %p1065_p5 = scmp.ne.s32.totalorder %s1060_s22, 0  ;;  %s466_s29 = scalar_lea.sflag [#allocation4], %s465_s23 }
  0xb7   : > { %p587_p10 = pnand %p591_p4, %p1065_p5 }
  0xb9   : > { %766 = dma.done.wait (!%p587_p10), %s466_s29, 128  }
  0xba   : > { %768 = vsyncadd (!%p587_p10), %s466_s29, 4294967168  ;;  %p18_p11 = scmp.ge.s32.totalorder %s833_s15, 6   ;;  %s1066_s9 = smov %s775_s10 }
  0xbb   : > { %s1067_s10 = smov %s779_s11  ;;  %s1068_s11 = smov %s845_s18 }
  0xbc   : > { %s1069_s12 = smov %s833_s15  ;;  %20 = sbr.rel (!%p18_p11) target bundleno = 7 (0x7), region = 86 }
  0xc3   :  { %471 = vsyncpa [#allocation3], 1 }
  0xc4   :  { %473 = vsyncpa [#allocation3 + $0x1], 1 }
  0xc5   :  { %474 = vsyncpa [#allocation6], 1 }
  0xc6   :  { %476 = vsyncpa [#allocation6 + $0x1], 1 }
  0xc7   :  { %477 = vsyncpa [#allocation4], 1 }
  0xc8   :  { %479 = vsyncpa [#allocation4 + $0x1], 1 }

</bundles_post_ra>
